<compile_context>
chip_gen: v6e
topology: v6e:2x2x1
jax: 0.10.0
libtpu: 0.0.40
codegen_flags: <defaults>
</compile_context>

<pallas_src>
import functools

import jax
import jax.numpy as jnp
from jax.experimental import pallas as pl
from jax.experimental.pallas import tpu as pltpu


def _round_up(x, m):
    return ((x + m - 1) // m) * m


def _cls_head_kernel(x_ref, m_ref, w1_ref, bd_ref, w2_ref, bo_ref,
                     out_ref, acc_ref, *, num_users):
    u = pl.program_id(1)

    @pl.when(u == 0)
    def _init():
        acc_ref[...] = jnp.zeros_like(acc_ref)

    x = x_ref[...]                                  # (TM, H)
    m = m_ref[...]                                  # (TM, U) float32

    # Mask column for the current user, without a dynamic lane slice.
    tm, nu = m.shape
    uids = jax.lax.broadcasted_iota(jnp.int32, (tm, nu), 1)
    col = jnp.sum(jnp.where(uids == u, m, 0.0), axis=1, keepdims=True)  # (TM,1)

    # MXU matmul with this user's dense_W slab; scale rows by the mask weight
    # and accumulate:  x @ (sum_u m_u W_u) == sum_u m_u (x @ W_u).
    contrib = jnp.dot(x, w1_ref[0], preferred_element_type=jnp.float32)  # (TM,H)
    acc_ref[...] += col * contrib

    @pl.when(u == num_users - 1)
    def _finalize():
        h = jnp.tanh(acc_ref[...] + bd_ref[...])        # (TM, H) f32
        h_c = h.astype(w2_ref.dtype)
        out = bo_ref[...].astype(jnp.float32)           # (TM, L)
        for uu in range(num_users):                     # small static unroll
            yu = jnp.dot(h_c, w2_ref[uu], preferred_element_type=jnp.float32)
            out = out + m[:, uu:uu + 1] * yu
        out_ref[...] = out.astype(out_ref.dtype)


def longformer_personalized_cls_head(hidden_states, user_mask,
                                     dense_W, dense_b, out_proj_W, out_proj_b,
                                     *, block_m=128, compute_dtype=None):
    """Eval-mode forward of LongformerPersonalizedClsHead.

    hidden_states: (B, S, H); user_mask: (B, U); dense_W: (U, H, H);
    dense_b: (U, H); out_proj_W: (U, H, L); out_proj_b: (U, L).
    Returns logits of shape (B, L) in float32.
    """
    B, _, H = hidden_states.shape
    U, _, L = out_proj_W.shape

    # Hoisted to XLA: CLS slice and per-sample bias mixing (tiny matmuls).
    x = hidden_states[:, 0, :]                              # (B, H)
    bd = (user_mask @ dense_b).astype(jnp.float32)          # (B, H)
    bo = (user_mask @ out_proj_b).astype(jnp.float32)       # (B, L)
    mask_f = user_mask.astype(jnp.float32)

    if compute_dtype is not None:                           # e.g. bf16 on v5e/v6e
        x = x.astype(compute_dtype)
        dense_W = dense_W.astype(compute_dtype)
        out_proj_W = out_proj_W.astype(compute_dtype)

    # Batch tiling; pad batch to a tile multiple (padded rows are all-zero and
    # are sliced off at the end).
    tm = min(block_m, _round_up(B, 8))
    Bp = _round_up(B, tm)
    if Bp != B:
        pad = ((0, Bp - B), (0, 0))
        x = jnp.pad(x, pad)
        mask_f = jnp.pad(mask_f, pad)
        bd = jnp.pad(bd, pad)
        bo = jnp.pad(bo, pad)

    kernel = functools.partial(_cls_head_kernel, num_users=U)
    out = pl.pallas_call(
        kernel,
        out_shape=jax.ShapeDtypeStruct((Bp, L), jnp.float32),
        grid=(Bp // tm, U),
        in_specs=[
            pl.BlockSpec((tm, H), lambda i, u: (i, 0)),        # x (CLS tile)
            pl.BlockSpec((tm, U), lambda i, u: (i, 0)),        # user_mask tile
            pl.BlockSpec((1, H, H), lambda i, u: (u, 0, 0)),   # dense_W[u] slab
            pl.BlockSpec((tm, H), lambda i, u: (i, 0)),        # mixed dense bias
            pl.BlockSpec((U, H, L), lambda i, u: (0, 0, 0)),   # out_proj_W (resident)
            pl.BlockSpec((tm, L), lambda i, u: (i, 0)),        # mixed out_proj bias
        ],
        out_specs=pl.BlockSpec((tm, L), lambda i, u: (i, 0)),
        scratch_shapes=[pltpu.VMEM((tm, H), jnp.float32)],
        compiler_params=pltpu.CompilerParams(
            dimension_semantics=("parallel", "arbitrary")),
    )(x, mask_f, dense_W, bd, out_proj_W, bo)
    return out[:B]


def _reference(hidden_states, user_mask, dense_W, dense_b, out_proj_W, out_proj_b):
    # Pure-JAX mirror of the PyTorch forward (eval mode).
    x = hidden_states[:, 0, :]
    Wd = jnp.einsum('bu,uhk->bhk', user_mask, dense_W)
    bd = user_mask @ dense_b
    h = jnp.tanh(jnp.einsum('bh,bhk->bk', x, Wd) + bd)
    Wo = jnp.einsum('bu,uhl->bhl', user_mask, out_proj_W)
    bo = user_mask @ out_proj_b
    return jnp.einsum('bh,bhl->bl', h, Wo) + bo


if __name__ == "__main__":
    B, S, H, U, L = 2, 8, 32, 4, 8      # batch, seq, hidden_size, num_users, num_labels
    key = jax.random.PRNGKey(0)
    k = jax.random.split(key, 7)

    hidden_states = jax.random.normal(k[0], (B, S, H), jnp.float32)
    user_ids = jax.random.randint(k[1], (B,), 0, U)
    user_mask = jax.nn.one_hot(user_ids, U, dtype=jnp.float32)

    # Deterministic parameter init mimicking kaiming_uniform(a=sqrt(5)) bounds.
    b1 = 1.0 / (H * H) ** 0.5
    dense_W = jax.random.uniform(k[2], (U, H, H), jnp.float32, -b1, b1)
    dense_b = jax.random.uniform(k[3], (U, H), jnp.float32, -b1, b1)
    b2 = 1.0 / (H * L) ** 0.5
    out_proj_W = jax.random.uniform(k[4], (U, H, L), jnp.float32, -b2, b2)
    out_proj_b = jax.random.uniform(k[5], (U, L), jnp.float32, -b2, b2)

    # One-hot mask (as produced by the trainer).
    out = longformer_personalized_cls_head(
        hidden_states, user_mask, dense_W, dense_b, out_proj_W, out_proj_b)
    out = jax.block_until_ready(out)
    ref = _reference(hidden_states, user_mask, dense_W, dense_b, out_proj_W, out_proj_b)
    assert out.shape == (B, L), out.shape
    assert jnp.allclose(out, ref, rtol=1e-5, atol=1e-5), (out, ref)

    # Soft (non-one-hot) mixing path also supported.
    soft_mask = jax.nn.softmax(jax.random.normal(k[6], (B, U), jnp.float32), axis=-1)
    out_s = longformer_personalized_cls_head(
        hidden_states, soft_mask, dense_W, dense_b, out_proj_W, out_proj_b)
    out_s = jax.block_until_ready(out_s)
    ref_s = _reference(hidden_states, soft_mask, dense_W, dense_b, out_proj_W, out_proj_b)
    assert jnp.allclose(out_s, ref_s, rtol=1e-5, atol=1e-5), (out_s, ref_s)

    print("KERNEL_OK")
</pallas_src>

<mosaic_0001>
module attributes {stable_mosaic.version = 11 : i64} {
  func.func @_cls_head_kernel(%arg0: i32, %arg1: i32, %arg2: memref<8x32xf32, #tpu.memory_space<vmem>>, %arg3: memref<8x4xf32, #tpu.memory_space<vmem>>, %arg4: memref<1x32x32xf32, #tpu.memory_space<vmem>>, %arg5: memref<8x32xf32, #tpu.memory_space<vmem>>, %arg6: memref<4x32x8xf32, #tpu.memory_space<vmem>>, %arg7: memref<8x8xf32, #tpu.memory_space<vmem>>, %arg8: memref<8x8xf32, #tpu.memory_space<vmem>>, %arg9: memref<8x32xf32, #tpu.memory_space<vmem>>) attributes {dimension_semantics = [#tpu.dimension_semantics<parallel>, #tpu.dimension_semantics<arbitrary>], iteration_bounds = array<i64: 1, 4>, scalar_prefetch = 0 : i64, scratch_operands = 1 : i64, tpu.core_type = #tpu.core_type<tc>, window_params = [{transform_indices = @transform_0, window_bounds = array<i64: 8, 32>}, {transform_indices = @transform_1, window_bounds = array<i64: 8, 4>}, {transform_indices = @transform_2, window_bounds = array<i64: 1, 32, 32>}, {transform_indices = @transform_3, window_bounds = array<i64: 8, 32>}, {pipeline_mode = #tpu.pipeline_mode<synchronous>, transform_indices = @transform_4, window_bounds = array<i64: 4, 32, 8>}, {transform_indices = @transform_5, window_bounds = array<i64: 8, 8>}, {transform_indices = @transform_6, window_bounds = array<i64: 8, 8>}]} {
    %c0_i32 = arith.constant 0 : i32
    %0 = arith.cmpi eq, %arg1, %c0_i32 : i32
    %1 = arith.extui %0 : i1 to i32
    %c0_i32_0 = arith.constant 0 : i32
    %2 = arith.cmpi ne, %1, %c0_i32_0 : i32
    scf.if %2 {
      %cst_14 = arith.constant 0.000000e+00 : f32
      %23 = vector.broadcast %cst_14 : f32 to vector<8x32xf32>
      %c0_15 = arith.constant 0 : index
      %c0_16 = arith.constant 0 : index
      %24 = vector.load %arg9[%c0_15, %c0_16] : memref<8x32xf32, #tpu.memory_space<vmem>>, vector<8x32xf32>
      tpu.vector_store %arg9[%c0_15, %c0_16], %23 {strides = array<i32>} : memref<8x32xf32, #tpu.memory_space<vmem>>, vector<8x32xf32>,
    } else {
    }
    %c0 = arith.constant 0 : index
    %c0_1 = arith.constant 0 : index
    %3 = vector.load %arg2[%c0, %c0_1] : memref<8x32xf32, #tpu.memory_space<vmem>>, vector<8x32xf32>
    %c0_2 = arith.constant 0 : index
    %c0_3 = arith.constant 0 : index
    %4 = vector.load %arg3[%c0_2, %c0_3] : memref<8x4xf32, #tpu.memory_space<vmem>>, vector<8x4xf32>
    %5 = tpu.iota {dimensions = array<i32: 1>} : vector<8x4xi32>
    %6 = vector.broadcast %arg1 : i32 to vector<8x4xi32>
    %7 = arith.cmpi eq, %5, %6 : vector<8x4xi32>
    %cst = arith.constant 0.000000e+00 : f32
    %8 = vector.broadcast %cst : f32 to vector<8x4xf32>
    %9 = arith.select %7, %4, %8 : vector<8x4xi1>, vector<8x4xf32>
    %cst_4 = arith.constant dense<0.000000e+00> : vector<8xf32>
    %10 = vector.multi_reduction <add>, %9, %cst_4 [1] : vector<8x4xf32> to vector<8xf32>
    %11 = vector.shape_cast %10 : vector<8xf32> to vector<8x1xf32>
    %c0_5 = arith.constant 0 : index
    %c0_6 = arith.constant 0 : index
    %c0_7 = arith.constant 0 : index
    %12 = vector.load %arg4[%c0_5, %c0_6, %c0_7] : memref<1x32x32xf32, #tpu.memory_space<vmem>>, vector<1x32x32xf32>
    %13 = vector.shape_cast %12 : vector<1x32x32xf32> to vector<32x32xf32>
    %cst_8 = arith.constant dense<0.000000e+00> : vector<8x32xf32>
    %14 = tpu.matmul %3, %13, %cst_8 {dimension_numbers = #tpu.dot_dimension_numbers<[1], [0], [0], [1], [0, 0, 1, 1], [], []>} : vector<8x32xf32>, vector<32x32xf32>, vector<8x32xf32> -> vector<8x32xf32>
    %c0_9 = arith.constant 0 : index
    %c0_10 = arith.constant 0 : index
    %15 = vector.load %arg9[%c0_9, %c0_10] : memref<8x32xf32, #tpu.memory_space<vmem>>, vector<8x32xf32>
    %16 = vector.broadcast %11 : vector<8x1xf32> to vector<8x32xf32>
    %17 = arith.mulf %16, %14 : vector<8x32xf32>
    %18 = arith.addf %15, %17 : vector<8x32xf32>
    %c0_11 = arith.constant 0 : index
    %c0_12 = arith.constant 0 : index
    %19 = vector.load %arg9[%c0_11, %c0_12] : memref<8x32xf32, #tpu.memory_space<vmem>>, vector<8x32xf32>
    tpu.vector_store %arg9[%c0_11, %c0_12], %18 {strides = array<i32>} : memref<8x32xf32, #tpu.memory_space<vmem>>, vector<8x32xf32>,
    %c3_i32 = arith.constant 3 : i32
    %20 = arith.cmpi eq, %arg1, %c3_i32 : i32
    %21 = arith.extui %20 : i1 to i32
    %c0_i32_13 = arith.constant 0 : i32
    %22 = arith.cmpi ne, %21, %c0_i32_13 : i32
    scf.if %22 {
      %c0_14 = arith.constant 0 : index
      %c0_15 = arith.constant 0 : index
      %23 = vector.load %arg9[%c0_14, %c0_15] : memref<8x32xf32, #tpu.memory_space<vmem>>, vector<8x32xf32>
      %c0_16 = arith.constant 0 : index
      %c0_17 = arith.constant 0 : index
      %24 = vector.load %arg5[%c0_16, %c0_17] : memref<8x32xf32, #tpu.memory_space<vmem>>, vector<8x32xf32>
      %25 = arith.addf %23, %24 : vector<8x32xf32>
      %26 = math.tanh %25 : vector<8x32xf32>
      %c0_18 = arith.constant 0 : index
      %c0_19 = arith.constant 0 : index
      %27 = vector.load %arg7[%c0_18, %c0_19] : memref<8x8xf32, #tpu.memory_space<vmem>>, vector<8x8xf32>
      %c0_20 = arith.constant 0 : index
      %c0_21 = arith.constant 0 : index
      %c0_22 = arith.constant 0 : index
      %28 = vector.load %arg6[%c0_20, %c0_21, %c0_22] : memref<4x32x8xf32, #tpu.memory_space<vmem>>, vector<1x32x8xf32>
      %29 = vector.shape_cast %28 : vector<1x32x8xf32> to vector<32x8xf32>
      %cst_23 = arith.constant dense<0.000000e+00> : vector<8x8xf32>
      %30 = tpu.matmul %26, %29, %cst_23 {dimension_numbers = #tpu.dot_dimension_numbers<[1], [0], [0], [1], [0, 0, 1, 1], [], []>} : vector<8x32xf32>, vector<32x8xf32>, vector<8x8xf32> -> vector<8x8xf32>
      %31 = vector.extract_strided_slice %4 {offsets = [0, 0], sizes = [8, 1], strides = [1, 1]} : vector<8x4xf32> to vector<8x1xf32>
      %32 = vector.broadcast %31 : vector<8x1xf32> to vector<8x8xf32>
      %33 = arith.mulf %32, %30 : vector<8x8xf32>
      %34 = arith.addf %27, %33 : vector<8x8xf32>
      %c1 = arith.constant 1 : index
      %c0_24 = arith.constant 0 : index
      %c0_25 = arith.constant 0 : index
      %35 = vector.load %arg6[%c1, %c0_24, %c0_25] : memref<4x32x8xf32, #tpu.memory_space<vmem>>, vector<1x32x8xf32>
      %36 = vector.shape_cast %35 : vector<1x32x8xf32> to vector<32x8xf32>
      %cst_26 = arith.constant dense<0.000000e+00> : vector<8x8xf32>
      %37 = tpu.matmul %26, %36, %cst_26 {dimension_numbers = #tpu.dot_dimension_numbers<[1], [0], [0], [1], [0, 0, 1, 1], [], []>} : vector<8x32xf32>, vector<32x8xf32>, vector<8x8xf32> -> vector<8x8xf32>
      %38 = vector.extract_strided_slice %4 {offsets = [0, 1], sizes = [8, 1], strides = [1, 1]} : vector<8x4xf32> to vector<8x1xf32>
      %39 = vector.broadcast %38 : vector<8x1xf32> to vector<8x8xf32>
      %40 = arith.mulf %39, %37 : vector<8x8xf32>
      %41 = arith.addf %34, %40 : vector<8x8xf32>
      %c2 = arith.constant 2 : index
      %c0_27 = arith.constant 0 : index
      %c0_28 = arith.constant 0 : index
      %42 = vector.load %arg6[%c2, %c0_27, %c0_28] : memref<4x32x8xf32, #tpu.memory_space<vmem>>, vector<1x32x8xf32>
      %43 = vector.shape_cast %42 : vector<1x32x8xf32> to vector<32x8xf32>
      %cst_29 = arith.constant dense<0.000000e+00> : vector<8x8xf32>
      %44 = tpu.matmul %26, %43, %cst_29 {dimension_numbers = #tpu.dot_dimension_numbers<[1], [0], [0], [1], [0, 0, 1, 1], [], []>} : vector<8x32xf32>, vector<32x8xf32>, vector<8x8xf32> -> vector<8x8xf32>
      %45 = vector.extract_strided_slice %4 {offsets = [0, 2], sizes = [8, 1], strides = [1, 1]} : vector<8x4xf32> to vector<8x1xf32>
      %46 = vector.broadcast %45 : vector<8x1xf32> to vector<8x8xf32>
      %47 = arith.mulf %46, %44 : vector<8x8xf32>
      %48 = arith.addf %41, %47 : vector<8x8xf32>
      %c3 = arith.constant 3 : index
      %c0_30 = arith.constant 0 : index
      %c0_31 = arith.constant 0 : index
      %49 = vector.load %arg6[%c3, %c0_30, %c0_31] : memref<4x32x8xf32, #tpu.memory_space<vmem>>, vector<1x32x8xf32>
      %50 = vector.shape_cast %49 : vector<1x32x8xf32> to vector<32x8xf32>
      %cst_32 = arith.constant dense<0.000000e+00> : vector<8x8xf32>
      %51 = tpu.matmul %26, %50, %cst_32 {dimension_numbers = #tpu.dot_dimension_numbers<[1], [0], [0], [1], [0, 0, 1, 1], [], []>} : vector<8x32xf32>, vector<32x8xf32>, vector<8x8xf32> -> vector<8x8xf32>
      %52 = vector.extract_strided_slice %4 {offsets = [0, 3], sizes = [8, 1], strides = [1, 1]} : vector<8x4xf32> to vector<8x1xf32>
      %53 = vector.broadcast %52 : vector<8x1xf32> to vector<8x8xf32>
      %54 = arith.mulf %53, %51 : vector<8x8xf32>
      %55 = arith.addf %48, %54 : vector<8x8xf32>
      %c0_33 = arith.constant 0 : index
      %c0_34 = arith.constant 0 : index
      %56 = vector.load %arg8[%c0_33, %c0_34] : memref<8x8xf32, #tpu.memory_space<vmem>>, vector<8x8xf32>
      tpu.vector_store %arg8[%c0_33, %c0_34], %55 {strides = array<i32>} : memref<8x8xf32, #tpu.memory_space<vmem>>, vector<8x8xf32>,
    } else {
    }
    return
  }
  func.func @transform_0(%arg0: i32, %arg1: i32) -> (i32, i32) {
    %c0_i32 = arith.constant 0 : i32
    %c0_i32_0 = arith.constant 0 : i32
    return %arg0, %c0_i32 : i32, i32
  }
  func.func @transform_1(%arg0: i32, %arg1: i32) -> (i32, i32) {
    %c0_i32 = arith.constant 0 : i32
    %c0_i32_0 = arith.constant 0 : i32
    return %arg0, %c0_i32 : i32, i32
  }
  func.func @transform_2(%arg0: i32, %arg1: i32) -> (i32, i32, i32) {
    %c0_i32 = arith.constant 0 : i32
    %c0_i32_0 = arith.constant 0 : i32
    %c0_i32_1 = arith.constant 0 : i32
    return %arg1, %c0_i32, %c0_i32_0 : i32, i32, i32
  }
  func.func @transform_3(%arg0: i32, %arg1: i32) -> (i32, i32) {
    %c0_i32 = arith.constant 0 : i32
    %c0_i32_0 = arith.constant 0 : i32
    return %arg0, %c0_i32 : i32, i32
  }
  func.func @transform_4(%arg0: i32, %arg1: i32) -> (i32, i32, i32) {
    %c0_i32 = arith.constant 0 : i32
    %c0_i32_0 = arith.constant 0 : i32
    %c0_i32_1 = arith.constant 0 : i32
    %c0_i32_2 = arith.constant 0 : i32
    return %c0_i32, %c0_i32_0, %c0_i32_1 : i32, i32, i32
  }
  func.func @transform_5(%arg0: i32, %arg1: i32) -> (i32, i32) {
    %c0_i32 = arith.constant 0 : i32
    %c0_i32_0 = arith.constant 0 : i32
    return %arg0, %c0_i32 : i32, i32
  }
  func.func @transform_6(%arg0: i32, %arg1: i32) -> (i32, i32) {
    %c0_i32 = arith.constant 0 : i32
    %c0_i32_0 = arith.constant 0 : i32
    return %arg0, %c0_i32 : i32, i32
  }
}

</mosaic_0001>

<bundles_post_ra>
// kernel: tpu_custom_call.1
= control target key start
LH: loop header
LB: loop body
LE: loop exit
PB: predicated region body
PF: predicated region fallthrough
CT: control target
= control target key end

     0   :  { %11 = vsyncpa [#allocation4], 0  ;;  %s1137_s21 = smov 0   ;;  %s1139_s22 = smov 0   ;;  %s1289_s0 = inlined_call_operand.vmem [shape: f32[8,32], index: 0, kind: input, shape index: {}]   ;;  %s1290_s1 = inlined_call_operand.vmem [shape: f32[8,4], index: 1, kind: input, shape index: {}]   ;;  %s1291_s2 = inlined_call_operand.vmem [shape: f32[4,32,32], index: 2, kind: input, shape index: {}]   ;;  %s1292_s3 = inlined_call_operand.vmem [shape: f32[8,32], index: 3, kind: input, shape index: {}]   ;;  %s1293_s4 = inlined_call_operand.vmem [shape: f32[4,32,8], index: 4, kind: input, shape index: {}]   ;;  %s1294_s5 = inlined_call_operand.vmem [shape: f32[8,8], index: 5, kind: input, shape index: {}]   ;;  %s1295_s6 = inlined_call_operand.hbm [shape: f32[8,8], index: 6, kind: output, shape index: {}]  }
   0x1   :  { %s1141_s23 = smov 0  }
   0x2 LB: > { %s879_s24 = sadd.s32 4294967295, %s1090_s23   ;;  %s26_s25 = sadd.s32 1, %s1086_s22  ;;  %s1090_s23 = sphi %s1141_s23, %s17_s23   ;;  %s1086_s22 = sphi %s1139_s22, %s1298_s22   ;;  %s1082_s21 = sphi %s1137_s21, %s1297_s21  }
   0x3   : > { %p27_p0 = scmp.ge.s32.totalorder %s26_s25, 4  ;;  %p886_p1 = scmp.ge.s32.totalorder %s1090_s23, 1 }
   0x4   : > { %p261_p2 = scmp.lt.s32.totalorder %s1090_s23, 5 }
   0x5   : > { %s1300_s25 = smov (%p27_p0, %s26_s25), 0 }
   0x6   : > { %p262_p3 = pnand %p886_p1, %p261_p2 }
   0x7   : > { %p310_p4 = scmp.lt.s32.totalorder (!%p262_p3), %s1082_s21, 3  ;;  %p889_p5 = scmp.ne.s32.totalorder (!%p262_p3), %s1082_s21, 0 }
   0x8   : > { %265 = sbr.rel (%p262_p3) target bundleno = 475 (0x1db), region = 44 }
   0xd   : > { %s311_s26 = scalar_select %p310_p4, %s1082_s21, 3 }
   0xe   : > { %326 = sbr.rel (%p889_p5) target bundleno = 21 (0x15), region = 48 }
   0xf   : > { %s912_s27 = sshll.u32 %s311_s26, 5 }
  0x10   : > { %s314_s30 = scalar_lea.vmem %s1291_s2, %s912_s27 }
  0x13   : > { %vm327_vm0 = vcmask 261120   ;;  %v1092_v0 = vmov 0.0  }
  0x14   : > { %328 = vst.msk [vmem:[#allocation2] sm:$0xff] %vm327_vm0, %v1092_v0 }
  0x15 PF: > { %v343_v1 = vld [vmem:[%s314_s30 + $0x18] sm:$0xff]  ;;  %v331_v2 = vlaneseq  ;;  %v1093_v3 = vmov 0.0   ;;  %v342_v4 = vld [vmem:[%s314_s30 + $0x10] sm:$0xff]  ;;  %vm1094_vm1 = vmmov 0   ;;  %v333_v5 = vstv %s1082_s21  ;;  %v1168_v6 = vld [vmem:[%s1290_s1] sm:$0xff]  ;;  %p891_p6 = scmp.ne.s32.totalorder %s1082_s21, 3 }
  0x16   : > { %938 = vmatprep.subr.mxu0 %v1093_v3  ;;  %946 = vmatprep.mubr.msk.f32.mxu0 %vm1094_vm1, %v1093_v3  ;;  %v341_v8 = vld [vmem:[%s314_s30 + $0x8] sm:$0xff]  ;;  %vm336_vm2 = vcmask 31744   ;;  %v340_v9 = vld [vmem:[%s314_s30] sm:$0xff]  ;;  %vm344_vm4 = vcmask 261120  }
  0x17   : > { %939 = vmatpush3.msra.mxu0 %v343_v1  ;;  %v332_v7 = vand.u32 127, %v331_v2  ;;  %v329_v11 = vld [vmem:[%s1289_s0] sm:$0xff] }
  0x18   : > { %940 = vmatprep.subr.mxu0 %v1093_v3 }
  0x19   : > { %941 = vmatpush3.msra.mxu0 %v342_v4  ;;  %vm334_vm3 = vcmp.eq.s32.totalorder %v332_v7, %v333_v5 }
  0x1a   : > { %942 = vmatprep.subr.mxu0 %v1093_v3  ;;  %v335_v10 = vsel %vm334_vm3, %v1168_v6, 0.0 }
  0x1b   : > { %943 = vmatpush3.msra.mxu0 %v341_v8  ;;  %v337_v12 = vsel %vm336_vm2, %v335_v10, 0.0  ;;  %v418_v15 = vld [vmem:[#allocation2] sm:$0xff] }
  0x1c   : > { %944 = vmatprep.subr.mxu0 %v1093_v3  ;;  %338 = vadd.xlane.f32.xlu0 %v337_v12 }
  0x1d   : > { %945 = vmatpush3.msra.mxu0 %v340_v9 }
  0x1e   : > { %947 = vmatmul.mubr.msk.f32.vlgmr.msra.gmra.mxu0 %vm344_vm4, %v329_v11 }
  0xa5   : > { %v339_v13 = vpop.xlane.xlu0 %338 }
  0xde   : > { %v414_v14 = vpop.f32.mrf.mxu0 }
  0xdf   : > { %v419_v16 = vmul.f32 %v414_v14, %v339_v13  ;;  %425 = sbr.rel (%p891_p6) target bundleno = 460 (0x1cc), region = 52 }
  0xe0   : > { %v948_v17 = vpop.f32.mrf.mxu0 }
  0xe1   : > { %v420_v18 = vadd.f32 %v419_v16, %v418_v15 }
  0xe3   : > { %421 = vst.msk [vmem:[#allocation2] sm:$0xff] %vm344_vm4, %v420_v18 }
  0xe4   : > { %v434_v19 = vld [vmem:[%s1293_s4 + $0x18] sm:$0xff]  ;;  %v1095_v21 = vmov 0.0   ;;  %v433_v22 = vld [vmem:[%s1293_s4 + $0x10] sm:$0xff]  ;;  %v432_v25 = vld [vmem:[%s1293_s4 + $0x8] sm:$0xff]  ;;  %vm1096_vm5 = vmmov 0   ;;  %v1097_v31 = vmov 0  }
  0xe5   : > { %v896_v20 = vld [vmem:[%s1293_s4 + $0x38] sm:$0xff]  ;;  %949 = vmatprep.subr.mxu0 %v1095_v21  ;;  %960 = vmatprep.subr.mxu1 %v1095_v21  ;;  %v895_v23 = vld [vmem:[%s1293_s4 + $0x30] sm:$0xff]  ;;  %v894_v26 = vld [vmem:[%s1293_s4 + $0x28] sm:$0xff]  ;;  %v1098_v32 = vmov 2   ;;  %v1099_v33 = vmov 1   ;;  %v1100_v34 = vmov 3  }
  0xe6   : > { %950 = vmatpush3.msra.mxu0 %v434_v19  ;;  %961 = vmatpush3.msra.mxu1 %v896_v20  ;;  %v427_v27 = vld [vmem:[%s1292_s3] sm:$0xff]  ;;  %v901_v35 = vld [vmem:[%s1293_s4 + $0x58] sm:$0xff]  ;;  %v900_v38 = vld [vmem:[%s1293_s4 + $0x50] sm:$0xff]  ;;  %vm758_vm6 = vcmask 64512  }
  0xe7   : > { %951 = vmatprep.subr.mxu0 %v1095_v21  ;;  %962 = vmatprep.subr.mxu1 %v1095_v21  ;;  %v431_v29 = vld [vmem:[%s1293_s4] sm:$0xff]  ;;  %v906_v36 = vld [vmem:[%s1293_s4 + $0x78] sm:$0xff]  ;;  %v905_v39 = vld [vmem:[%s1293_s4 + $0x70] sm:$0xff] }
  0xe8   : > { %952 = vmatpush3.msra.mxu0 %v433_v22  ;;  %963 = vmatpush3.msra.mxu1 %v895_v23  ;;  %v893_v30 = vld [vmem:[%s1293_s4 + $0x20] sm:$0xff]  ;;  %v899_v40 = vld [vmem:[%s1293_s4 + $0x48] sm:$0xff] }
  0xe9   : > { %953 = vmatprep.subr.mxu0 %v1095_v21  ;;  %964 = vmatprep.subr.mxu1 %v1095_v21  ;;  %v904_v41 = vld [vmem:[%s1293_s4 + $0x68] sm:$0xff]  ;;  %v898_v42 = vld [vmem:[%s1293_s4 + $0x40] sm:$0xff] }
  0xea   : > { %v426_v24 = vld [vmem:[#allocation2] sm:$0xff]  ;;  %954 = vmatpush3.msra.mxu0 %v432_v25  ;;  %965 = vmatpush3.msra.mxu1 %v894_v26 }
  0xeb   : > { %v428_v28 = vadd.f32 %v427_v27, %v426_v24  ;;  %955 = vmatprep.subr.mxu0 %v1095_v21  ;;  %966 = vmatprep.subr.mxu1 %v1095_v21  ;;  %v903_v43 = vld [vmem:[%s1293_s4 + $0x60] sm:$0xff] }
  0xec   : > { %956 = vmatpush3.msra.mxu0 %v431_v29  ;;  %967 = vmatpush3.msra.mxu1 %v893_v30  ;;  %v430_v51 = vld [vmem:[%s1294_s5] sm:$0xff] }
  0xed   : > { %1038 = vtanh.f32 %v428_v28  ;;  %957 = vmatprep.mubr.msk.f32.mxu0 %vm1096_vm5, %v1095_v21  ;;  %968 = vmatprep.mubr.msk.f32.mxu1 %vm1096_vm5, %v1095_v21 }
  0xee   : > { %971 = vmatprep.subr.mxu0 %v1095_v21  ;;  %982 = vmatprep.subr.mxu1 %v1095_v21 }
  0xef   : > { %1033 = vset.pattern.permute.xlu0 %v1097_v31  ;;  %1035 = vset.pattern.permute.xlu1 %v1098_v32 }
  0xf0   : > { %510 = vperm.xlu0 %1033, %v1168_v6   ;;  %672 = vperm.xlu1 %1035, %v1168_v6  }
  0xf4   : > { %1034 = vset.pattern.permute.xlu0 %v1099_v33  ;;  %1036 = vset.pattern.permute.xlu1 %v1100_v34 }
  0xf5   : > { %591 = vperm.xlu0 %1034, %v1168_v6   ;;  %753 = vperm.xlu1 %1036, %v1168_v6  }
  0xf9   : > { %1037 = vset.pattern.permute.xlu0 %v1100_v34 }
  0xfa   : > { %v1039_v37 = vpop.eup %1038 }
  0xfb   : > { %958 = vmatmul.mubr.msk.f32.vlgmr.msra.gmra.mxu0 %vm344_vm4, %v1039_v37  ;;  %969 = vmatmul.mubr.msk.f32.vlgmr.msra.gmra.mxu1 %vm344_vm4, %v1039_v37 }
  0xfc   : > { %972 = vmatpush3.msra.mxu0 %v901_v35  ;;  %983 = vmatpush3.msra.mxu1 %v906_v36 }
  0xfd   : > { %973 = vmatprep.subr.mxu0 %v1095_v21  ;;  %984 = vmatprep.subr.mxu1 %v1095_v21 }
  0xfe   : > { %974 = vmatpush3.msra.mxu0 %v900_v38  ;;  %985 = vmatpush3.msra.mxu1 %v905_v39 }
  0xff   : > { %975 = vmatprep.subr.mxu0 %v1095_v21  ;;  %986 = vmatprep.subr.mxu1 %v1095_v21 }
 0x100   : > { %976 = vmatpush3.msra.mxu0 %v899_v40  ;;  %987 = vmatpush3.msra.mxu1 %v904_v41 }
 0x101   : > { %977 = vmatprep.subr.mxu0 %v1095_v21  ;;  %988 = vmatprep.subr.mxu1 %v1095_v21 }
 0x102   : > { %978 = vmatpush3.msra.mxu0 %v898_v42  ;;  %979 = vmatprep.mubr.msk.f32.mxu0 %vm1096_vm5, %v1095_v21 }
 0x103   : > { %989 = vmatpush3.msra.mxu1 %v903_v43  ;;  %990 = vmatprep.mubr.msk.f32.mxu1 %vm1096_vm5, %v1095_v21 }
 0x104   : > { %980 = vmatmul.mubr.msk.f32.vlgmr.msra.gmra.mxu0 %vm344_vm4, %v1039_v37  ;;  %991 = vmatmul.mubr.msk.f32.vlgmr.msra.gmra.mxu1 %vm344_vm4, %v1039_v37 }
 0x16b   : > { %v511_v44 = vpop.permute.xlu0 %510  ;;  %v673_v47 = vpop.permute.xlu1 %672 }
 0x170   : > { %v592_v52 = vpop.permute.xlu0 %591  ;;  %v754_v55 = vpop.permute.xlu1 %753 }
 0x1bb   : > { %v504_v45 = vpop.f32.mrf.mxu0  ;;  %v586_v46 = vpop.f32.mrf.mxu1 }
 0x1bc   : > { %v513_v48 = vmul.f32 %v511_v44, %v504_v45  ;;  %v594_v54 = vmul.f32 %v592_v52, %v586_v46 }
 0x1bd   : > { %v959_v49 = vpop.f32.mrf.mxu0  ;;  %v970_v50 = vpop.f32.mrf.mxu1 }
 0x1be   : > { %v514_v53 = vadd.f32 %v513_v48, %v430_v51 }
 0x1c0   : > { %v595_v58 = vadd.f32 %v594_v54, %v514_v53 }
 0x1c4   : > { %v667_v56 = vpop.f32.mrf.mxu0  ;;  %v748_v57 = vpop.f32.mrf.mxu1 }
 0x1c5   : > { %v675_v59 = vmul.f32 %v673_v47, %v667_v56  ;;  %v756_v60 = vmul.f32 %v754_v55, %v748_v57 }
 0x1c6   : > { %v981_v61 = vpop.f32.mrf.mxu0  ;;  %v992_v62 = vpop.f32.mrf.mxu1 }
 0x1c7   : > { %v676_v63 = vadd.f32 %v675_v59, %v595_v58 }
 0x1c9   : > { %v757_v0 = vadd.f32 %v756_v60, %v676_v63 }
 0x1cb   : > { %759 = vst.msk [vmem:[#allocation3] sm:$0xff] %vm758_vm6, %v757_v0 }
 0x1cc PF: > { %p1265_p7 = scmp.eq.s32.totalorder %s879_s24, 3  ;;  %s1101_s8 = smov [#allocation3]  }
 0x1cd   : > { %s769_s9 = sshll.u32 %s1101_s8, 4  ;;  %s770_s9 = int_to_ptr.vmem [resolvable:$true] %s769_s9 }
 0x1ce   : > { %s1040_s10 = scalar_lea.vmem %s770_s9, 128  ;;  %p1047_p11 = scmp.lt.s32.totalorder %s770_s9, %s770_s9 }
 0x1cf   : > { %p1041_p8 = scmp.ne.s32.totalorder %s770_s9, %s1040_s10  ;;  %p1048_p12 = scmp.lt.s32.totalorder %s1040_s10, %s1040_s10 }
 0x1d1   : > { %p1042_p9 = pnand %p1041_p8, %p1265_p7  ;;  %p1049_p13 = por %p1048_p12, %p1047_p11 }
 0x1d3   : > { %p1043_p10 = pneg %p1042_p9 }
 0x1d5   : > { %p1050_p0 = pnand %p1049_p13, %p1043_p10 }
 0x1d7   : > { %1053 = shalt.err (!%p1050_p0)
}
 0x1d8   : > { %994 = dma.vmem_to_hbm [thread:$0]  (%p1265_p7), %s770_s9, 128, %s1295_s6, [#allocation4]  }
 0x1d9   : > { %1077 = dma.done.wait (%p1265_p7), [#allocation4], 128  }
 0x1da   : > { %1079 = vsyncadd (%p1265_p7), [#allocation4], 4294967168 }
 0x1db PF: > { %s17_s23 = sadd.s32 1, %s1090_s23   ;;  %s1297_s21 = smov %s1086_s22 }
 0x1dc   : > { %p14_p1 = scmp.ge.s32.totalorder %s17_s23, 6   ;;  %s1298_s22 = smov %s1300_s25 }
 0x1de   :  { %16 = sbr.rel (!%p14_p1) target bundleno = 2 (0x2), region = 95 }
 0x1e3   :  { %782 = vsyncpa [#allocation4], 1 }
 0x1e4   :  { %784 = vsyncpa [#allocation4 + $0x1], 1 }

</bundles_post_ra>
